<compile_context>
chip_gen: v7x
topology: tpu7x:2x2x1
jax: 0.10.0
libtpu: 0.0.40
codegen_flags: <defaults>
</compile_context>

<pallas_src>
import jax
import jax.numpy as jnp
from jax import lax
from jax.experimental import pallas as pl
from jax.experimental.pallas import tpu as pltpu


# ----------------------------------------------------------------------------
# Pallas kernel: fused embedding gather + 3-layer MLP + sigmoid
# ----------------------------------------------------------------------------
def fused_recommender_kernel(uid_ref, mid_ref, utbl_ref, mtbl_ref,
                             w1u_ref, w1m_ref, w2_ref, consts_ref, o_ref):
    f32 = jnp.float32
    uid = uid_ref[...]                                   # (TB, 1) int32
    mid = mid_ref[...]                                   # (TB, 1) int32
    tb = uid.shape[0]
    n_user = utbl_ref.shape[0]
    n_movie = mtbl_ref.shape[0]

    # --- embedding gather via one-hot matmul (MXU) ---------------------------
    u_oh = (uid == lax.broadcasted_iota(jnp.int32, (tb, n_user), 1)).astype(f32)
    m_oh = (mid == lax.broadcasted_iota(jnp.int32, (tb, n_movie), 1)).astype(f32)
    user_emb = jnp.dot(u_oh, utbl_ref[...], preferred_element_type=f32)   # (TB, Eu)
    movie_emb = jnp.dot(m_oh, mtbl_ref[...], preferred_element_type=f32)  # (TB, Em)

    # --- packed constants -----------------------------------------------------
    c = consts_ref[...]                                  # (8, 128)
    b1 = c[0:1, 0:64]                                    # (1, 64)
    b2 = c[1:2, 0:32]                                    # (1, 32)
    w3_row = c[2:3, 0:32]                                # (1, 32)
    b3 = c[3:4, 0:1]                                     # (1, 1)

    # --- layer 1: concat([u, m]) @ W1 == u @ W1[:Eu] + m @ W1[Eu:] ------------
    h1 = (jnp.dot(user_emb, w1u_ref[...], preferred_element_type=f32)
          + jnp.dot(movie_emb, w1m_ref[...], preferred_element_type=f32)
          + b1)
    h1 = jnp.maximum(h1, 0.0)                            # (TB, 64)  ReLU

    # --- layer 2 --------------------------------------------------------------
    h2 = jnp.dot(h1, w2_ref[...], preferred_element_type=f32) + b2
    h2 = jnp.maximum(h2, 0.0)                            # (TB, 32)  ReLU

    # --- layer 3 (N=1): VPU multiply + lane reduction, not a 1-col MXU op -----
    z = jnp.sum(h2 * w3_row, axis=-1, keepdims=True) + b3   # (TB, 1)

    # --- sigmoid: exp + approximate EUP reciprocal ----------------------------
    o_ref[...] = pl.reciprocal(1.0 + jnp.exp(-z), approx=True)


# ----------------------------------------------------------------------------
# Wrapper: batch tiling, weight packing, padding
# ----------------------------------------------------------------------------
def compact_recommender_forward(user_id, movie_id, params, tile_b=512):
    utbl = params["user_embedding"]          # (U, Eu)
    mtbl = params["movie_embedding"]         # (M, Em)
    w1, b1 = params["w1"], params["b1"]      # (Eu+Em, 64), (64,)
    w2, b2 = params["w2"], params["b2"]      # (64, 32),    (32,)
    w3, b3 = params["w3"], params["b3"]      # (32, 1),     (1,)
    eu = utbl.shape[1]

    batch = user_id.shape[0]
    tile_b = max(8, (tile_b // 8) * 8)                       # multiple of 8
    tb = min(tile_b, ((batch + 7) // 8) * 8)                 # fits VMEM easily
    grid_b = pl.cdiv(batch, tb)
    padded_b = grid_b * tb

    uid = user_id.astype(jnp.int32)
    mid = movie_id.astype(jnp.int32)
    if padded_b != batch:
        uid = jnp.pad(uid, (0, padded_b - batch))
        mid = jnp.pad(mid, (0, padded_b - batch))
    uid = uid.reshape(padded_b, 1)
    mid = mid.reshape(padded_b, 1)

    # Split W1 so the concat never has to be materialized.
    w1u = w1[:eu]                                            # (Eu, 64)
    w1m = w1[eu:]                                            # (Em, 64)

    # Pack biases + w3 row into one (8, 128) constants block (single DMA).
    consts = jnp.zeros((8, 128), jnp.float32)
    consts = consts.at[0, :64].set(b1)
    consts = consts.at[1, :32].set(b2)
    consts = consts.at[2, :32].set(w3.reshape(-1))
    consts = consts.at[3, 0].set(b3[0])

    resident = lambda a: pl.BlockSpec(a.shape, lambda i: (0, 0))

    out = pl.pallas_call(
        fused_recommender_kernel,
        out_shape=jax.ShapeDtypeStruct((padded_b, 1), jnp.float32),
        grid=(grid_b,),
        in_specs=[
            pl.BlockSpec((tb, 1), lambda i: (i, 0)),      # user ids (tiled)
            pl.BlockSpec((tb, 1), lambda i: (i, 0)),      # movie ids (tiled)
            resident(utbl),                               # VMEM-resident table
            resident(mtbl),                               # VMEM-resident table
            resident(w1u),
            resident(w1m),
            resident(w2),
            pl.BlockSpec((8, 128), lambda i: (0, 0)),     # packed consts
        ],
        out_specs=pl.BlockSpec((tb, 1), lambda i: (i, 0)),
        compiler_params=pltpu.CompilerParams(
            dimension_semantics=("parallel",),            # v7x: 2 TCs share batch
        ),
    )(uid, mid, utbl, mtbl, w1u, w1m, w2, consts)

    return out[:batch]


# ----------------------------------------------------------------------------
# Pure-JAX reference (mirrors the PyTorch forward, inference mode)
# ----------------------------------------------------------------------------
def reference_forward(user_id, movie_id, params):
    u = jnp.take(params["user_embedding"], user_id, axis=0)
    m = jnp.take(params["movie_embedding"], movie_id, axis=0)
    x = jnp.concatenate([u, m], axis=1)
    h1 = jnp.maximum(x @ params["w1"] + params["b1"], 0.0)
    h2 = jnp.maximum(h1 @ params["w2"] + params["b2"], 0.0)
    z = h2 @ params["w3"] + params["b3"]
    return jax.nn.sigmoid(z)


# ----------------------------------------------------------------------------
# Deterministic parameter init (Xavier-uniform style, like the PyTorch module)
# ----------------------------------------------------------------------------
def xavier_uniform(key, shape):
    fan_in, fan_out = shape[0], shape[1]
    limit = jnp.sqrt(6.0 / (fan_in + fan_out))
    return jax.random.uniform(key, shape, jnp.float32, -limit, limit)


def init_params(key, user_count, movie_count, emb_user, emb_movie):
    keys = jax.random.split(key, 8)
    d_in = emb_user + emb_movie
    return {
        "user_embedding": xavier_uniform(keys[0], (user_count, emb_user)),
        "movie_embedding": xavier_uniform(keys[1], (movie_count, emb_movie)),
        "w1": xavier_uniform(keys[2], (d_in, 64)),
        "b1": jax.random.uniform(keys[3], (64,), jnp.float32, -0.1, 0.1),
        "w2": xavier_uniform(keys[4], (64, 32)),
        "b2": jax.random.uniform(keys[5], (32,), jnp.float32, -0.1, 0.1),
        "w3": xavier_uniform(keys[6], (32, 1)),
        "b3": jax.random.uniform(keys[7], (1,), jnp.float32, -0.1, 0.1),
    }


if __name__ == "__main__":
    key = jax.random.PRNGKey(0)
    k_params, k_user, k_movie, k_user2, k_movie2 = jax.random.split(key, 5)

    user_count, movie_count = 32, 48
    emb_user, emb_movie = 16, 16

    params = init_params(k_params, user_count, movie_count, emb_user, emb_movie)

    # --- small batch (single tile) -------------------------------------------
    batch = 8
    user_id = jax.random.randint(k_user, (batch,), 0, user_count, dtype=jnp.int32)
    movie_id = jax.random.randint(k_movie, (batch,), 0, movie_count, dtype=jnp.int32)

    out = compact_recommender_forward(user_id, movie_id, params)
    out = jax.block_until_ready(out)
    assert out.shape == (batch, 1)
    assert bool(jnp.all((out >= 0.0) & (out <= 1.0)))
    ref = reference_forward(user_id, movie_id, params)
    assert bool(jnp.allclose(out, ref, rtol=2e-2, atol=2e-2))

    # --- larger, non-divisible batch (multi-tile grid + padding path) --------
    batch2 = 50
    user_id2 = jax.random.randint(k_user2, (batch2,), 0, user_count, dtype=jnp.int32)
    movie_id2 = jax.random.randint(k_movie2, (batch2,), 0, movie_count, dtype=jnp.int32)

    out2 = compact_recommender_forward(user_id2, movie_id2, params, tile_b=16)
    out2 = jax.block_until_ready(out2)
    assert out2.shape == (batch2, 1)
    ref2 = reference_forward(user_id2, movie_id2, params)
    assert bool(jnp.allclose(out2, ref2, rtol=2e-2, atol=2e-2))

    print("KERNEL_OK")
</pallas_src>

<mosaic_0001>
module attributes {stable_mosaic.version = 11 : i64} {
  func.func @fused_recommender_kernel(%arg0: i32, %arg1: memref<8x1xi32, #tpu.memory_space<vmem>>, %arg2: memref<8x1xi32, #tpu.memory_space<vmem>>, %arg3: memref<32x16xf32, #tpu.memory_space<vmem>>, %arg4: memref<48x16xf32, #tpu.memory_space<vmem>>, %arg5: memref<16x64xf32, #tpu.memory_space<vmem>>, %arg6: memref<16x64xf32, #tpu.memory_space<vmem>>, %arg7: memref<64x32xf32, #tpu.memory_space<vmem>>, %arg8: memref<8x128xf32, #tpu.memory_space<vmem>>, %arg9: memref<8x1xf32, #tpu.memory_space<vmem>>) attributes {dimension_semantics = [#tpu.dimension_semantics<parallel>], iteration_bounds = array<i64: 1>, scalar_prefetch = 0 : i64, scratch_operands = 0 : i64, tpu.core_type = #tpu.core_type<tc>, window_params = [{transform_indices = @transform_0, window_bounds = array<i64: 8, 1>}, {transform_indices = @transform_1, window_bounds = array<i64: 8, 1>}, {pipeline_mode = #tpu.pipeline_mode<synchronous>, transform_indices = @transform_2, window_bounds = array<i64: 32, 16>}, {pipeline_mode = #tpu.pipeline_mode<synchronous>, transform_indices = @transform_3, window_bounds = array<i64: 48, 16>}, {pipeline_mode = #tpu.pipeline_mode<synchronous>, transform_indices = @transform_4, window_bounds = array<i64: 16, 64>}, {pipeline_mode = #tpu.pipeline_mode<synchronous>, transform_indices = @transform_5, window_bounds = array<i64: 16, 64>}, {pipeline_mode = #tpu.pipeline_mode<synchronous>, transform_indices = @transform_6, window_bounds = array<i64: 64, 32>}, {pipeline_mode = #tpu.pipeline_mode<synchronous>, transform_indices = @transform_7, window_bounds = array<i64: 8, 128>}, {transform_indices = @transform_8, window_bounds = array<i64: 8, 1>}]} {
    %c0 = arith.constant 0 : index
    %c0_0 = arith.constant 0 : index
    %0 = vector.load %arg1[%c0, %c0_0] : memref<8x1xi32, #tpu.memory_space<vmem>>, vector<8x1xi32>
    %c0_1 = arith.constant 0 : index
    %c0_2 = arith.constant 0 : index
    %1 = vector.load %arg2[%c0_1, %c0_2] : memref<8x1xi32, #tpu.memory_space<vmem>>, vector<8x1xi32>
    %2 = tpu.iota {dimensions = array<i32: 1>} : vector<8x32xi32>
    %3 = vector.broadcast %0 : vector<8x1xi32> to vector<8x32xi32>
    %4 = arith.cmpi eq, %3, %2 : vector<8x32xi32>
    %5 = arith.extui %4 : vector<8x32xi1> to vector<8x32xi32>
    %6 = arith.sitofp %5 : vector<8x32xi32> to vector<8x32xf32>
    %7 = tpu.iota {dimensions = array<i32: 1>} : vector<8x48xi32>
    %8 = vector.broadcast %1 : vector<8x1xi32> to vector<8x48xi32>
    %9 = arith.cmpi eq, %8, %7 : vector<8x48xi32>
    %10 = arith.extui %9 : vector<8x48xi1> to vector<8x48xi32>
    %11 = arith.sitofp %10 : vector<8x48xi32> to vector<8x48xf32>
    %c0_3 = arith.constant 0 : index
    %c0_4 = arith.constant 0 : index
    %12 = vector.load %arg3[%c0_3, %c0_4] : memref<32x16xf32, #tpu.memory_space<vmem>>, vector<32x16xf32>
    %cst = arith.constant dense<0.000000e+00> : vector<8x16xf32>
    %13 = tpu.matmul %6, %12, %cst {dimension_numbers = #tpu.dot_dimension_numbers<[1], [0], [0], [1], [0, 0, 1, 1], [], []>} : vector<8x32xf32>, vector<32x16xf32>, vector<8x16xf32> -> vector<8x16xf32>
    %c0_5 = arith.constant 0 : index
    %c0_6 = arith.constant 0 : index
    %14 = vector.load %arg4[%c0_5, %c0_6] : memref<48x16xf32, #tpu.memory_space<vmem>>, vector<48x16xf32>
    %cst_7 = arith.constant dense<0.000000e+00> : vector<8x16xf32>
    %15 = tpu.matmul %11, %14, %cst_7 {dimension_numbers = #tpu.dot_dimension_numbers<[1], [0], [0], [1], [0, 0, 1, 1], [], []>} : vector<8x48xf32>, vector<48x16xf32>, vector<8x16xf32> -> vector<8x16xf32>
    %c0_8 = arith.constant 0 : index
    %c0_9 = arith.constant 0 : index
    %16 = vector.load %arg8[%c0_8, %c0_9] : memref<8x128xf32, #tpu.memory_space<vmem>>, vector<8x128xf32>
    %17 = vector.extract_strided_slice %16 {offsets = [0, 0], sizes = [1, 64], strides = [1, 1]} : vector<8x128xf32> to vector<1x64xf32>
    %18 = vector.extract_strided_slice %16 {offsets = [1, 0], sizes = [1, 32], strides = [1, 1]} : vector<8x128xf32> to vector<1x32xf32>
    %19 = vector.extract_strided_slice %16 {offsets = [2, 0], sizes = [1, 32], strides = [1, 1]} : vector<8x128xf32> to vector<1x32xf32>
    %20 = vector.extract_strided_slice %16 {offsets = [3, 0], sizes = [1, 1], strides = [1, 1]} : vector<8x128xf32> to vector<1x1xf32>
    %c0_10 = arith.constant 0 : index
    %c0_11 = arith.constant 0 : index
    %21 = vector.load %arg5[%c0_10, %c0_11] : memref<16x64xf32, #tpu.memory_space<vmem>>, vector<16x64xf32>
    %cst_12 = arith.constant dense<0.000000e+00> : vector<8x64xf32>
    %22 = tpu.matmul %13, %21, %cst_12 {dimension_numbers = #tpu.dot_dimension_numbers<[1], [0], [0], [1], [0, 0, 1, 1], [], []>} : vector<8x16xf32>, vector<16x64xf32>, vector<8x64xf32> -> vector<8x64xf32>
    %c0_13 = arith.constant 0 : index
    %c0_14 = arith.constant 0 : index
    %23 = vector.load %arg6[%c0_13, %c0_14] : memref<16x64xf32, #tpu.memory_space<vmem>>, vector<16x64xf32>
    %cst_15 = arith.constant dense<0.000000e+00> : vector<8x64xf32>
    %24 = tpu.matmul %15, %23, %cst_15 {dimension_numbers = #tpu.dot_dimension_numbers<[1], [0], [0], [1], [0, 0, 1, 1], [], []>} : vector<8x16xf32>, vector<16x64xf32>, vector<8x64xf32> -> vector<8x64xf32>
    %25 = arith.addf %22, %24 : vector<8x64xf32>
    %26 = vector.broadcast %17 : vector<1x64xf32> to vector<8x64xf32>
    %27 = arith.addf %25, %26 : vector<8x64xf32>
    %cst_16 = arith.constant 0.000000e+00 : f32
    %28 = vector.broadcast %cst_16 : f32 to vector<8x64xf32>
    %29 = arith.maximumf %27, %28 : vector<8x64xf32>
    %c0_17 = arith.constant 0 : index
    %c0_18 = arith.constant 0 : index
    %30 = vector.load %arg7[%c0_17, %c0_18] : memref<64x32xf32, #tpu.memory_space<vmem>>, vector<64x32xf32>
    %cst_19 = arith.constant dense<0.000000e+00> : vector<8x32xf32>
    %31 = tpu.matmul %29, %30, %cst_19 {dimension_numbers = #tpu.dot_dimension_numbers<[1], [0], [0], [1], [0, 0, 1, 1], [], []>} : vector<8x64xf32>, vector<64x32xf32>, vector<8x32xf32> -> vector<8x32xf32>
    %32 = vector.broadcast %18 : vector<1x32xf32> to vector<8x32xf32>
    %33 = arith.addf %31, %32 : vector<8x32xf32>
    %cst_20 = arith.constant 0.000000e+00 : f32
    %34 = vector.broadcast %cst_20 : f32 to vector<8x32xf32>
    %35 = arith.maximumf %33, %34 : vector<8x32xf32>
    %36 = vector.broadcast %19 : vector<1x32xf32> to vector<8x32xf32>
    %37 = arith.mulf %35, %36 : vector<8x32xf32>
    %cst_21 = arith.constant dense<0.000000e+00> : vector<8xf32>
    %38 = vector.multi_reduction <add>, %37, %cst_21 [1] : vector<8x32xf32> to vector<8xf32>
    %39 = vector.shape_cast %38 : vector<8xf32> to vector<8x1xf32>
    %40 = vector.broadcast %20 : vector<1x1xf32> to vector<8x1xf32>
    %41 = arith.addf %39, %40 : vector<8x1xf32>
    %cst_22 = arith.constant 0.000000e+00 : f32
    %42 = vector.broadcast %cst_22 : f32 to vector<8x1xf32>
    %43 = arith.subf %42, %41 : vector<8x1xf32>
    %44 = math.exp %43 : vector<8x1xf32>
    %cst_23 = arith.constant 1.000000e+00 : f32
    %45 = vector.broadcast %cst_23 : f32 to vector<8x1xf32>
    %46 = arith.addf %45, %44 : vector<8x1xf32>
    %47 = tpu.reciprocal %46 {approx = true} : vector<8x1xf32> -> vector<8x1xf32>
    %c0_24 = arith.constant 0 : index
    %c0_25 = arith.constant 0 : index
    %48 = vector.load %arg9[%c0_24, %c0_25] : memref<8x1xf32, #tpu.memory_space<vmem>>, vector<8x1xf32>
    tpu.vector_store %arg9[%c0_24, %c0_25], %47 {strides = array<i32>} : memref<8x1xf32, #tpu.memory_space<vmem>>, vector<8x1xf32>,
    return
  }
  func.func @transform_0(%arg0: i32) -> (i32, i32) {
    %c0_i32 = arith.constant 0 : i32
    %c0_i32_0 = arith.constant 0 : i32
    return %arg0, %c0_i32 : i32, i32
  }
  func.func @transform_1(%arg0: i32) -> (i32, i32) {
    %c0_i32 = arith.constant 0 : i32
    %c0_i32_0 = arith.constant 0 : i32
    return %arg0, %c0_i32 : i32, i32
  }
  func.func @transform_2(%arg0: i32) -> (i32, i32) {
    %c0_i32 = arith.constant 0 : i32
    %c0_i32_0 = arith.constant 0 : i32
    %c0_i32_1 = arith.constant 0 : i32
    return %c0_i32, %c0_i32_0 : i32, i32
  }
  func.func @transform_3(%arg0: i32) -> (i32, i32) {
    %c0_i32 = arith.constant 0 : i32
    %c0_i32_0 = arith.constant 0 : i32
    %c0_i32_1 = arith.constant 0 : i32
    return %c0_i32, %c0_i32_0 : i32, i32
  }
  func.func @transform_4(%arg0: i32) -> (i32, i32) {
    %c0_i32 = arith.constant 0 : i32
    %c0_i32_0 = arith.constant 0 : i32
    %c0_i32_1 = arith.constant 0 : i32
    return %c0_i32, %c0_i32_0 : i32, i32
  }
  func.func @transform_5(%arg0: i32) -> (i32, i32) {
    %c0_i32 = arith.constant 0 : i32
    %c0_i32_0 = arith.constant 0 : i32
    %c0_i32_1 = arith.constant 0 : i32
    return %c0_i32, %c0_i32_0 : i32, i32
  }
  func.func @transform_6(%arg0: i32) -> (i32, i32) {
    %c0_i32 = arith.constant 0 : i32
    %c0_i32_0 = arith.constant 0 : i32
    %c0_i32_1 = arith.constant 0 : i32
    return %c0_i32, %c0_i32_0 : i32, i32
  }
  func.func @transform_7(%arg0: i32) -> (i32, i32) {
    %c0_i32 = arith.constant 0 : i32
    %c0_i32_0 = arith.constant 0 : i32
    %c0_i32_1 = arith.constant 0 : i32
    return %c0_i32, %c0_i32_0 : i32, i32
  }
  func.func @transform_8(%arg0: i32) -> (i32, i32) {
    %c0_i32 = arith.constant 0 : i32
    %c0_i32_0 = arith.constant 0 : i32
    return %arg0, %c0_i32 : i32, i32
  }
}

</mosaic_0001>

<bundles_post_ra>
// kernel: tpu_custom_call.1
= control target key start
LH: loop header
LB: loop body
LE: loop exit
PB: predicated region body
PF: predicated region fallthrough
CT: control target
= control target key end

     0   :  { %v607_v0 = vmov 0   ;;  %v608_v2 = vmov 0.0|0.0   ;;  %vm609_vm0 = vmmov 0   ;;  %v610_v11 = vmov 0.0   ;;  %s752_s1 = inlined_call_operand.vmem [shape: s32[8,1], index: 1, kind: input, shape index: {}]   ;;  %s753_s0 = inlined_call_operand.vmem [shape: s32[8,1], index: 0, kind: input, shape index: {}]   ;;  %s754_s3 = inlined_call_operand.vmem [shape: f32[48,16], index: 3, kind: input, shape index: {}]   ;;  %s755_s2 = inlined_call_operand.vmem [shape: f32[32,16], index: 2, kind: input, shape index: {}]   ;;  %s756_s5 = inlined_call_operand.vmem [shape: f32[16,64], index: 5, kind: input, shape index: {}]   ;;  %s757_s6 = inlined_call_operand.vmem [shape: f32[64,32], index: 6, kind: input, shape index: {}]   ;;  %s758_s4 = inlined_call_operand.vmem [shape: f32[16,64], index: 4, kind: input, shape index: {}]   ;;  %s759_s7 = inlined_call_operand.vmem [shape: f32[8,128], index: 7, kind: input, shape index: {}]   ;;  %s760_s8 = inlined_call_operand.vmem [shape: f32[8,1], index: 8, kind: output, shape index: {}]  }
   0x1   :  { %602 = vset.pattern.permute.xlu0 %v607_v0  ;;  %v30_v1 = vld [vmem:[%s752_s1] sm:$0xff]  ;;  %571 = vmatprep.subr.bf16.mxu1 %v608_v2  ;;  %v124_v4 = vld [vmem:[%s754_s3 + $0x8] sm:$0xff]  ;;  %v125_v5 = vld [vmem:[%s754_s3 + $0x10] sm:$0xff]  ;;  %v31_v20 = vlaneseq  ;;  %vm129_vm1 = vcmask 392192   ;;  %vm49_vm3 = vcmask 261120   ;;  %vm208_vm5 = vcmask 130048  }
   0x2   :  { %v123_v3 = vld [vmem:[%s754_s3] sm:$0xff]  ;;  %40 = vperm.xlu0 %602, %v30_v1   ;;  %v126_v6 = vld [vmem:[%s754_s3 + $0x18] sm:$0xff]  ;;  %565 = vmatprep.subr.bf16.mxu0 %v608_v2  ;;  %v46_v10 = vld [vmem:[%s755_s2 + $0x8] sm:$0xff]  ;;  %vm373_vm6 = vcmask 523264   ;;  %vm466_vm7 = vcmask 7168  }
   0x3   :  { %v29_v7 = vld [vmem:[%s753_s0] sm:$0xff]  ;;  %v572_v8 = vpack.c.bf16 %v124_v4, %v123_v3  ;;  %529 = vmatprep.mubr.msk.f32.mxu1 %vm609_vm0, %v610_v11  ;;  %514 = vmatprep.mubr.msk.f32.mxu0 %vm609_vm0, %v610_v11  ;;  %v47_v13 = vld [vmem:[%s755_s2 + $0x10] sm:$0xff]  ;;  %v48_v14 = vld [vmem:[%s755_s2 + $0x18] sm:$0xff]  ;;  %v575_v15 = vpack.c.bf16 %v126_v6, %v125_v5  ;;  %v32_v21 = vand.u32 127, %v31_v20  ;;  %v356_v48 = vshrl.u32 %v31_v20, 7 }
   0x4   :  { %v45_v9 = vld [vmem:[%s755_s2] sm:$0xff]  ;;  %v128_v17 = vld [vmem:[%s754_s3 + $0x28] sm:$0xff]  ;;  %v569_v18 = vpack.c.bf16 %v48_v14, %v47_v13  ;;  %v363_v39 = vld [vmem:[%s757_s6 + $0x10] sm:$0xff] }
   0x5   :  { %v566_v12 = vpack.c.bf16 %v46_v10, %v45_v9  ;;  %573 = vmatpush3.bf16.msra.mxu1 %v572_v8  ;;  %v127_v16 = vld [vmem:[%s754_s3 + $0x20] sm:$0xff]  ;;  %v207_v24 = vld [vmem:[%s756_s5 + $0x8] sm:$0xff]  ;;  %v364_v40 = vld [vmem:[%s757_s6 + $0x18] sm:$0xff]  ;;  %v357_v49 = vsub.s32 0, %v356_v48  ;;  %v371_v59 = vsub.s32 1, %v356_v48  ;;  %v450_v61 = vsub.s32 2, %v356_v48 }
   0x6   :  { %34 = vperm.xlu0 %602, %v29_v7   ;;  %574 = vmatprep.subr.bf16.mxu1 %v608_v2  ;;  %v578_v19 = vpack.c.bf16 %v128_v17, %v127_v16  ;;  %v206_v23 = vld [vmem:[%s756_s5] sm:$0xff]  ;;  %v362_v30 = vld [vmem:[%s757_s6 + $0x8] sm:$0xff]  ;;  %v590_v41 = vpack.c.bf16 %v364_v40, %v363_v39  ;;  %v367_v45 = vld [vmem:[%s757_s6 + $0x30] sm:$0xff]  ;;  %v458_v5 = vsub.s32 3, %v356_v48 }
   0x7   :  { %567 = vmatpush3.bf16.msra.mxu0 %v566_v12  ;;  %v581_v27 = vpack.c.bf16 %v207_v24, %v206_v23  ;;  %v361_v29 = vld [vmem:[%s757_s6] sm:$0xff]  ;;  %v205_v33 = vld [vmem:[%s758_s4 + $0x8] sm:$0xff]  ;;  %v368_v46 = vld [vmem:[%s757_s6 + $0x38] sm:$0xff] }
   0x8   :  { %568 = vmatprep.subr.bf16.mxu0 %v608_v2  ;;  %v587_v31 = vpack.c.bf16 %v362_v30, %v361_v29  ;;  %v204_v32 = vld [vmem:[%s758_s4] sm:$0xff]  ;;  %v366_v43 = vld [vmem:[%s757_s6 + $0x28] sm:$0xff]  ;;  %v596_v47 = vpack.c.bf16 %v368_v46, %v367_v45 }
   0x9   :  { %576 = vmatpush3.bf16.msra.mxu1 %v575_v15  ;;  %v584_v34 = vpack.c.bf16 %v205_v33, %v204_v32  ;;  %v365_v42 = vld [vmem:[%s757_s6 + $0x20] sm:$0xff] }
   0xa   :  { %577 = vmatprep.subr.bf16.mxu1 %v608_v2  ;;  %v593_v44 = vpack.c.bf16 %v366_v43, %v365_v42  ;;  %v203_v51 = vld [vmem:[%s759_s7] sm:$0xff] }
   0xb   :  { %570 = vmatpush3.bf16.msra.mxu0 %v569_v18  ;;  %v358_v53 = vrot.slane %v203_v51, %v357_v49  ;;  %v372_v60 = vrot.slane %v203_v51, %v371_v59  ;;  %v451_v1 = vrot.slane %v203_v51, %v450_v61  ;;  %v459_v6 = vrot.slane %v203_v51, %v458_v5 }
   0xc   :  { %580 = vmatprep.subr.bf16.mxu0 %v608_v2 }
   0xd   :  { %579 = vmatpush3.bf16.msra.mxu1 %v578_v19 }
   0xe   :  { %586 = vmatprep.subr.bf16.mxu1 %v608_v2 }
  0x81   :  { %v41_v22 = vpop.permute.xlu0 %40 }
  0x82   :  { %vm42_vm2 = vcmp.eq.s32.totalorder %v41_v22, %v32_v21 }
  0x83   :  { %v473_v25 = vsel %vm42_vm2, 1.0, %v610_v11 }
  0x84   :  { %530 = vmatmul.mubr.msk.f32.vlgmr.msra.gmra.mrb[0].mxu1 %vm129_vm1, %v473_v25 }
  0x85   :  { %v35_v26 = vpop.permute.xlu0 %34  ;;  %562 = vmatprep.mubr.msk.f32.mxu1 %vm609_vm0, %v610_v11  ;;  %588 = vmatpush3.bf16.msra.mxu1 %v587_v31 }
  0x86   :  { %vm36_vm4 = vcmp.eq.s32.totalorder %v35_v26, %v32_v21  ;;  %589 = vmatprep.subr.bf16.mxu1 %v608_v2 }
  0x87   :  { %v472_v28 = vsel %vm36_vm4, 1.0, %v610_v11 }
  0x88   :  { %515 = vmatmul.mubr.msk.f32.vlgmr.msra.gmra.mrb[0].mxu0 %vm49_vm3, %v472_v28 }
  0x89   :  { %582 = vmatpush3.bf16.msra.mxu0 %v581_v27  ;;  %536 = vmatprep.mubr.msk.f32.mxu0 %vm609_vm0, %v610_v11 }
  0x8a   :  { %583 = vmatprep.subr.bf16.mxu0 %v608_v2  ;;  %591 = vmatpush3.bf16.msra.mxu1 %v590_v41 }
  0x8b   :  { %592 = vmatprep.subr.bf16.mxu1 %v608_v2 }
  0x8e   :  { %594 = vmatpush3.bf16.msra.mxu1 %v593_v44 }
  0x8f   :  { %595 = vmatprep.subr.bf16.mxu1 %v608_v2 }
  0x92   :  { %597 = vmatpush3.bf16.msra.mxu1 %v596_v47 }
 0x157   :  { %v199_v35 = vpop.f32.mrb[0].mxu1 }
 0x158   :  { %v531_v36 = vpop.f32.mrb[1].mxu1  ;;  %537 = vmatmul.mubr.msk.f32.vlgmr.msra.gmra.mrb[2].mxu0 %vm208_vm5, %v199_v35 }
 0x159   :  { %585 = vmatpush3.bf16.msra.mxu0 %v584_v34  ;;  %543 = vmatprep.mubr.msk.f32.mxu0 %vm609_vm0, %v610_v11 }
 0x15b   :  { %v119_v37 = vpop.f32.mrb[0].mxu0 }
 0x15c   :  { %v516_v38 = vpop.f32.mrb[1].mxu0  ;;  %544 = vmatmul.mubr.msk.f32.vlgmr.msra.gmra.mrb[4].mxu0 %vm208_vm5, %v119_v37 }
 0x22b   :  { %v278_v50 = vpop.f32.mrb[2].mxu0 }
 0x22c   :  { %v538_v52 = vpop.f32.mrb[3].mxu0 }
 0x22f   :  { %v351_v54 = vpop.f32.mrb[4].mxu0 }
 0x230   :  { %v352_v55 = vadd.f32 %v351_v54, %v278_v50  ;;  %v545_v56 = vpop.f32.mrb[5].mxu0 }
 0x232   :  { %v359_v57 = vadd.f32 %v358_v53, %v352_v55 }
 0x234   :  { %v360_v58 = vmax.f32 %v359_v57, 0.0 }
 0x236   :  { %563 = vmatmul.mubr.msk.f32.vlgmr.msra.gmra.mrb[2].mxu1 %vm373_vm6, %v360_v58 }
 0x309   :  { %v443_v62 = vpop.f32.mrb[2].mxu1 }
 0x30a   :  { %v444_v63 = vadd.f32 %v443_v62, %v372_v60  ;;  %v564_v0 = vpop.f32.mrb[3].mxu1 }
 0x30c   :  { %v447_v2 = vmax.f32 %v444_v63, 0.0 }
 0x30e   :  { %v452_v3 = vmul.f32 %v451_v1, %v447_v2 }
 0x310   :  { %v453_v4 = vsel %vm49_vm3, %v452_v3, 0.0 }
 0x311   :  { %454 = vadd.xlane.f32.xlu1 %v453_v4 }
 0x39e   :  { %v455_v7 = vpop.xlane.xlu1 %454 }
 0x39f   :  { %v460_v8 = vadd.f32 %v459_v6, %v455_v7 }
 0x3a1   :  { %v461_v9 = vsub.f32 0.0, %v460_v8 }
 0x3a3   :  { %v462_v10 = vmul.f32 1.442695, %v461_v9 }
 0x3a5   :  { %603 = vpow2.f32 %v462_v10 }
 0x3af   :  { %v604_v11 = vpop.eup %603 }
 0x3b0   :  { %v464_v12 = vadd.f32 1.0, %v604_v11 }
 0x3b2   :  { %605 = vrcp.f32 %v464_v12 }
 0x3bc   :  { %v606_v13 = vpop.eup %605 }
 0x3bd   :  { %467 = vst.msk [vmem:[%s760_s8] sm:$0xff] %vm466_vm7, %v606_v13 }

</bundles_post_ra>
